<compile_context>
chip_gen: v7x
topology: tpu7x:2x2x1
jax: 0.10.0
libtpu: 0.0.40
codegen_flags: <defaults>
</compile_context>

<pallas_src>
import functools

import jax
import jax.numpy as jnp
from jax import lax
from jax.experimental import pallas as pl
from jax.experimental.pallas import tpu as pltpu

LANE = 128      # pad feature / node axes to multiples of 128 lanes
SUB = 8         # sublane multiple for the (tiny) graph axis


def _round_up(x, m):
    return (x + m - 1) // m * m


def _pad2d(x, rows, cols):
    return jnp.pad(x, ((0, rows - x.shape[0]), (0, cols - x.shape[1])))


# ------------------------------ Pallas kernel --------------------------------
def gnn_fused_kernel(x_ref, a_ref, pa_ref, w1_ref, b1_ref, w2_ref, b2_ref,
                     wf_ref, bf_ref, out_ref, *, output_dim):
    """Whole forward pass on VMEM-resident (padded) operands, single grid step."""
    # conv1: H1 = relu(A_hat @ (X @ W1) + b1)
    xw = jnp.dot(x_ref[...], w1_ref[...],
                 preferred_element_type=jnp.float32)                 # (N, H) f32
    h1 = jnp.maximum(
        jnp.dot(a_ref[...], xw.astype(jnp.bfloat16),
                preferred_element_type=jnp.float32) + b1_ref[...], 0.0)

    # conv2 matmul + mean pool, using pooled = (P @ A_hat) @ (H1 @ W2) + b2
    hw = jnp.dot(h1.astype(jnp.bfloat16), w2_ref[...],
                 preferred_element_type=jnp.float32)                 # (N, H) f32
    pooled = jnp.dot(pa_ref[...], hw.astype(jnp.bfloat16),
                     preferred_element_type=jnp.float32) + b2_ref[...]   # (G, H)

    # fc + masked log_softmax (all f32)
    logits = jnp.dot(pooled, wf_ref[...],
                     preferred_element_type=jnp.float32) + bf_ref[...]   # (G, O)
    col = lax.broadcasted_iota(jnp.int32, logits.shape, 1)
    logits = jnp.where(col < output_dim, logits, -jnp.inf)
    m = jnp.max(logits, axis=1, keepdims=True)
    z = logits - m
    lse = jnp.log(jnp.sum(jnp.exp(z), axis=1, keepdims=True))
    out_ref[...] = (z - lse).astype(out_ref.dtype)


# ------------------------------- forward -------------------------------------
def gnn_forward(x, a_hat, pool, w1, b1, w2, b2, wf, bf):
    n, f_in = x.shape
    h_dim = w1.shape[1]
    o_dim = wf.shape[1]
    n_graphs = pool.shape[0]

    npad = _round_up(n, LANE)
    fpad = _round_up(f_in, LANE)
    hpad = _round_up(h_dim, LANE)
    opad = _round_up(o_dim, LANE)
    gpad = _round_up(n_graphs, SUB)

    # Precompute PA = P @ A_hat (tiny: gpad x npad) so the O(N^2*H) second conv
    # collapses to an O(G*N*H) product inside the kernel.
    pa = jnp.dot(pool, a_hat, precision=jax.lax.Precision.HIGHEST,
                 preferred_element_type=jnp.float32)

    # lane-dense zero-padded operands; bf16 for the MXU, f32 accumulation in-kernel
    x_p = _pad2d(x, npad, fpad).astype(jnp.bfloat16)
    a_p = _pad2d(a_hat, npad, npad).astype(jnp.bfloat16)
    pa_p = _pad2d(pa, gpad, npad).astype(jnp.bfloat16)
    w1_p = _pad2d(w1, fpad, hpad).astype(jnp.bfloat16)
    w2_p = _pad2d(w2, hpad, hpad).astype(jnp.bfloat16)
    wf_p = _pad2d(wf, hpad, opad).astype(jnp.float32)
    b1_p = _pad2d(b1, 1, hpad).astype(jnp.float32)
    b2_p = _pad2d(b2, 1, hpad).astype(jnp.float32)
    bf_p = _pad2d(bf, 1, opad).astype(jnp.float32)

    flops = 2 * (npad * fpad * hpad          # X @ W1
                 + npad * npad * hpad        # A_hat @ XW
                 + npad * hpad * hpad        # H1 @ W2
                 + gpad * npad * hpad        # PA @ HW
                 + gpad * hpad * opad)       # fc
    bytes_accessed = (2 * (npad * fpad + npad * npad + gpad * npad
                           + fpad * hpad + hpad * hpad)
                      + 4 * (hpad * opad + 2 * hpad + opad + gpad * opad))

    out_pad = pl.pallas_call(
        functools.partial(gnn_fused_kernel, output_dim=o_dim),
        out_shape=jax.ShapeDtypeStruct((gpad, opad), jnp.float32),
        grid=(1,),
        in_specs=[
            pl.BlockSpec((npad, fpad), lambda i: (0, 0)),   # X
            pl.BlockSpec((npad, npad), lambda i: (0, 0)),   # A_hat
            pl.BlockSpec((gpad, npad), lambda i: (0, 0)),   # PA = P @ A_hat
            pl.BlockSpec((fpad, hpad), lambda i: (0, 0)),   # W1
            pl.BlockSpec((1, hpad), lambda i: (0, 0)),      # b1
            pl.BlockSpec((hpad, hpad), lambda i: (0, 0)),   # W2
            pl.BlockSpec((1, hpad), lambda i: (0, 0)),      # b2
            pl.BlockSpec((hpad, opad), lambda i: (0, 0)),   # Wf
            pl.BlockSpec((1, opad), lambda i: (0, 0)),      # bf
        ],
        out_specs=pl.BlockSpec((gpad, opad), lambda i: (0, 0)),
        compiler_params=pltpu.CompilerParams(
            dimension_semantics=("arbitrary",),
            vmem_limit_bytes=32 * 1024 * 1024),
        cost_estimate=pl.CostEstimate(
            flops=int(flops),
            transcendentals=int(gpad * opad),
            bytes_accessed=int(bytes_accessed)),
    )(x_p, a_p, pa_p, w1_p, b1_p, w2_p, b2_p, wf_p, bf_p)

    return out_pad[:n_graphs, :o_dim]


# --------------------------- graph preprocessing ------------------------------
def build_normalized_adj(edge_index, num_nodes):
    """Dense D^-1/2 (A + I) D^-1/2 (symmetric norm, self loops), like PyG GCNConv."""
    src, dst = edge_index[0], edge_index[1]
    a = jnp.zeros((num_nodes, num_nodes), dtype=jnp.float32)
    a = a.at[src, dst].set(1.0)
    a = a.at[dst, src].set(1.0)            # undirected graph
    a = a + jnp.eye(num_nodes, dtype=jnp.float32)
    deg = jnp.sum(a, axis=1)
    d_inv_sqrt = jnp.where(deg > 0, 1.0 / jnp.sqrt(deg), 0.0)
    return a * d_inv_sqrt[:, None] * d_inv_sqrt[None, :]


def build_mean_pool_matrix(batch, num_graphs, num_nodes):
    """P[g, n] = 1/|graph g| if node n belongs to graph g else 0."""
    onehot = (batch[None, :] == jnp.arange(num_graphs)[:, None]).astype(jnp.float32)
    counts = jnp.maximum(jnp.sum(onehot, axis=1, keepdims=True), 1.0)
    return onehot / counts


# ---------------------------------- reference ---------------------------------
def gnn_reference(x, a_hat, pool, w1, b1, w2, b2, wf, bf):
    """Pure-JAX reference mirroring the kernel's mixed precision and the
    (P @ A_hat) reassociation (mathematically identical to the module)."""
    hi = jax.lax.Precision.HIGHEST
    pa = jnp.dot(pool, a_hat, precision=hi, preferred_element_type=jnp.float32)
    x_bf, a_bf = x.astype(jnp.bfloat16), a_hat.astype(jnp.bfloat16)
    w1_bf, w2_bf = w1.astype(jnp.bfloat16), w2.astype(jnp.bfloat16)
    xw = jnp.dot(x_bf, w1_bf, preferred_element_type=jnp.float32).astype(jnp.bfloat16)
    h1 = jnp.maximum(jnp.dot(a_bf, xw, preferred_element_type=jnp.float32) + b1,
                     0.0).astype(jnp.bfloat16)
    hw = jnp.dot(h1, w2_bf, preferred_element_type=jnp.float32).astype(jnp.bfloat16)
    g = jnp.dot(pa.astype(jnp.bfloat16), hw,
                preferred_element_type=jnp.float32) + b2
    logits = jnp.dot(g, wf, precision=hi, preferred_element_type=jnp.float32) + bf
    return logits - jax.scipy.special.logsumexp(logits, axis=1, keepdims=True)


# ------------------------------------ main ------------------------------------
if __name__ == "__main__":
    input_dim, hidden_dim, output_dim = 16, 32, 8
    graph_sizes = [70, 70, 60]
    num_graphs = len(graph_sizes)
    num_nodes = sum(graph_sizes)        # 200 -> padded to 256

    key = jax.random.PRNGKey(0)
    k_x, k_w1, k_w2, k_wf, k_b1, k_b2, k_bf = jax.random.split(key, 7)

    x = jax.random.normal(k_x, (num_nodes, input_dim), jnp.float32)

    # deterministic graph: a ring inside each graph plus one chord per graph
    edges = []
    start = 0
    for sz in graph_sizes:
        for i in range(sz):
            edges.append((start + i, start + (i + 1) % sz))
        edges.append((start, start + sz // 2))
        start += sz
    edge_index = jnp.array(edges, dtype=jnp.int32).T            # (2, E)

    batch = jnp.concatenate([jnp.full((sz,), g, jnp.int32)
                             for g, sz in enumerate(graph_sizes)])

    w1 = jax.random.normal(k_w1, (input_dim, hidden_dim), jnp.float32) * 0.5
    b1 = jax.random.normal(k_b1, (1, hidden_dim), jnp.float32) * 0.1
    w2 = jax.random.normal(k_w2, (hidden_dim, hidden_dim), jnp.float32) * 0.5
    b2 = jax.random.normal(k_b2, (1, hidden_dim), jnp.float32) * 0.1
    wf = jax.random.normal(k_wf, (hidden_dim, output_dim), jnp.float32) * 0.5
    bf = jax.random.normal(k_bf, (1, output_dim), jnp.float32) * 0.1

    a_hat = build_normalized_adj(edge_index, num_nodes)
    pool = build_mean_pool_matrix(batch, num_graphs, num_nodes)

    out = gnn_forward(x, a_hat, pool, w1, b1, w2, b2, wf, bf)
    out = jax.block_until_ready(out)

    ref = gnn_reference(x, a_hat, pool, w1, b1, w2, b2, wf, bf)
    assert out.shape == (num_graphs, output_dim)
    assert bool(jnp.all(jnp.isfinite(out)))
    assert jnp.allclose(out, ref, atol=2e-2, rtol=2e-2), (
        f"max abs diff {jnp.max(jnp.abs(out - ref))}")

    print("KERNEL_OK")
</pallas_src>

<mosaic_0001>
module attributes {stable_mosaic.version = 11 : i64} {
  func.func @gnn_fused_kernel(%arg0: i32, %arg1: memref<256x128xbf16, #tpu.memory_space<vmem>>, %arg2: memref<256x256xbf16, #tpu.memory_space<vmem>>, %arg3: memref<8x256xbf16, #tpu.memory_space<vmem>>, %arg4: memref<128x128xbf16, #tpu.memory_space<vmem>>, %arg5: memref<1x128xf32, #tpu.memory_space<vmem>>, %arg6: memref<128x128xbf16, #tpu.memory_space<vmem>>, %arg7: memref<1x128xf32, #tpu.memory_space<vmem>>, %arg8: memref<128x128xf32, #tpu.memory_space<vmem>>, %arg9: memref<1x128xf32, #tpu.memory_space<vmem>>, %arg10: memref<8x128xf32, #tpu.memory_space<vmem>>) attributes {dimension_semantics = [#tpu.dimension_semantics<arbitrary>], iteration_bounds = array<i64: 1>, scalar_prefetch = 0 : i64, scratch_operands = 0 : i64, tpu.core_type = #tpu.core_type<tc>, window_params = [{pipeline_mode = #tpu.pipeline_mode<synchronous>, transform_indices = @transform_0, window_bounds = array<i64: 256, 128>}, {pipeline_mode = #tpu.pipeline_mode<synchronous>, transform_indices = @transform_1, window_bounds = array<i64: 256, 256>}, {pipeline_mode = #tpu.pipeline_mode<synchronous>, transform_indices = @transform_2, window_bounds = array<i64: 8, 256>}, {pipeline_mode = #tpu.pipeline_mode<synchronous>, transform_indices = @transform_3, window_bounds = array<i64: 128, 128>}, {pipeline_mode = #tpu.pipeline_mode<synchronous>, transform_indices = @transform_4, window_bounds = array<i64: 1, 128>}, {pipeline_mode = #tpu.pipeline_mode<synchronous>, transform_indices = @transform_5, window_bounds = array<i64: 128, 128>}, {pipeline_mode = #tpu.pipeline_mode<synchronous>, transform_indices = @transform_6, window_bounds = array<i64: 1, 128>}, {pipeline_mode = #tpu.pipeline_mode<synchronous>, transform_indices = @transform_7, window_bounds = array<i64: 128, 128>}, {pipeline_mode = #tpu.pipeline_mode<synchronous>, transform_indices = @transform_8, window_bounds = array<i64: 1, 128>}, {pipeline_mode = #tpu.pipeline_mode<synchronous>, transform_indices = @transform_9, window_bounds = array<i64: 8, 128>}]} {
    %c0 = arith.constant 0 : index
    %c0_0 = arith.constant 0 : index
    %0 = vector.load %arg1[%c0, %c0_0] : memref<256x128xbf16, #tpu.memory_space<vmem>>, vector<256x128xbf16>
    %c0_1 = arith.constant 0 : index
    %c0_2 = arith.constant 0 : index
    %1 = vector.load %arg4[%c0_1, %c0_2] : memref<128x128xbf16, #tpu.memory_space<vmem>>, vector<128x128xbf16>
    %cst = arith.constant dense<0.000000e+00> : vector<256x128xf32>
    %2 = tpu.matmul %0, %1, %cst {dimension_numbers = #tpu.dot_dimension_numbers<[1], [0], [0], [1], [0, 0, 1, 1], [], []>} : vector<256x128xbf16>, vector<128x128xbf16>, vector<256x128xf32> -> vector<256x128xf32>
    %c0_3 = arith.constant 0 : index
    %c0_4 = arith.constant 0 : index
    %3 = vector.load %arg2[%c0_3, %c0_4] : memref<256x256xbf16, #tpu.memory_space<vmem>>, vector<256x256xbf16>
    %4 = arith.truncf %2 : vector<256x128xf32> to vector<256x128xbf16>
    %cst_5 = arith.constant dense<0.000000e+00> : vector<256x128xf32>
    %5 = tpu.matmul %3, %4, %cst_5 {dimension_numbers = #tpu.dot_dimension_numbers<[1], [0], [0], [1], [0, 0, 1, 1], [], []>} : vector<256x256xbf16>, vector<256x128xbf16>, vector<256x128xf32> -> vector<256x128xf32>
    %c0_6 = arith.constant 0 : index
    %c0_7 = arith.constant 0 : index
    %6 = vector.load %arg5[%c0_6, %c0_7] : memref<1x128xf32, #tpu.memory_space<vmem>>, vector<1x128xf32>
    %7 = vector.broadcast %6 : vector<1x128xf32> to vector<256x128xf32>
    %8 = arith.addf %5, %7 : vector<256x128xf32>
    %cst_8 = arith.constant 0.000000e+00 : f32
    %9 = vector.broadcast %cst_8 : f32 to vector<256x128xf32>
    %10 = arith.maximumf %8, %9 : vector<256x128xf32>
    %11 = arith.truncf %10 : vector<256x128xf32> to vector<256x128xbf16>
    %c0_9 = arith.constant 0 : index
    %c0_10 = arith.constant 0 : index
    %12 = vector.load %arg6[%c0_9, %c0_10] : memref<128x128xbf16, #tpu.memory_space<vmem>>, vector<128x128xbf16>
    %cst_11 = arith.constant dense<0.000000e+00> : vector<256x128xf32>
    %13 = tpu.matmul %11, %12, %cst_11 {dimension_numbers = #tpu.dot_dimension_numbers<[1], [0], [0], [1], [0, 0, 1, 1], [], []>} : vector<256x128xbf16>, vector<128x128xbf16>, vector<256x128xf32> -> vector<256x128xf32>
    %c0_12 = arith.constant 0 : index
    %c0_13 = arith.constant 0 : index
    %14 = vector.load %arg3[%c0_12, %c0_13] : memref<8x256xbf16, #tpu.memory_space<vmem>>, vector<8x256xbf16>
    %15 = arith.truncf %13 : vector<256x128xf32> to vector<256x128xbf16>
    %cst_14 = arith.constant dense<0.000000e+00> : vector<8x128xf32>
    %16 = tpu.matmul %14, %15, %cst_14 {dimension_numbers = #tpu.dot_dimension_numbers<[1], [0], [0], [1], [0, 0, 1, 1], [], []>} : vector<8x256xbf16>, vector<256x128xbf16>, vector<8x128xf32> -> vector<8x128xf32>
    %c0_15 = arith.constant 0 : index
    %c0_16 = arith.constant 0 : index
    %17 = vector.load %arg7[%c0_15, %c0_16] : memref<1x128xf32, #tpu.memory_space<vmem>>, vector<1x128xf32>
    %18 = vector.broadcast %17 : vector<1x128xf32> to vector<8x128xf32>
    %19 = arith.addf %16, %18 : vector<8x128xf32>
    %c0_17 = arith.constant 0 : index
    %c0_18 = arith.constant 0 : index
    %20 = vector.load %arg8[%c0_17, %c0_18] : memref<128x128xf32, #tpu.memory_space<vmem>>, vector<128x128xf32>
    %cst_19 = arith.constant dense<0.000000e+00> : vector<8x128xf32>
    %21 = tpu.matmul %19, %20, %cst_19 {dimension_numbers = #tpu.dot_dimension_numbers<[1], [0], [0], [1], [0, 0, 1, 1], [], []>} : vector<8x128xf32>, vector<128x128xf32>, vector<8x128xf32> -> vector<8x128xf32>
    %c0_20 = arith.constant 0 : index
    %c0_21 = arith.constant 0 : index
    %22 = vector.load %arg9[%c0_20, %c0_21] : memref<1x128xf32, #tpu.memory_space<vmem>>, vector<1x128xf32>
    %23 = vector.broadcast %22 : vector<1x128xf32> to vector<8x128xf32>
    %24 = arith.addf %21, %23 : vector<8x128xf32>
    %25 = tpu.iota {dimensions = array<i32: 1>} : vector<8x128xi32>
    %c8_i32 = arith.constant 8 : i32
    %26 = vector.broadcast %c8_i32 : i32 to vector<8x128xi32>
    %27 = arith.cmpi slt, %25, %26 : vector<8x128xi32>
    %cst_22 = arith.constant 0xFF800000 : f32
    %28 = vector.broadcast %cst_22 : f32 to vector<8x128xf32>
    %29 = arith.select %27, %24, %28 : vector<8x128xi1>, vector<8x128xf32>
    %cst_23 = arith.constant dense<0xFF800000> : vector<8xf32>
    %30 = vector.multi_reduction <maximumf>, %29, %cst_23 [1] : vector<8x128xf32> to vector<8xf32>
    %31 = vector.shape_cast %30 : vector<8xf32> to vector<8x1xf32>
    %32 = vector.broadcast %31 : vector<8x1xf32> to vector<8x128xf32>
    %33 = arith.subf %29, %32 : vector<8x128xf32>
    %34 = math.exp %33 : vector<8x128xf32>
    %cst_24 = arith.constant dense<0.000000e+00> : vector<8xf32>
    %35 = vector.multi_reduction <add>, %34, %cst_24 [1] : vector<8x128xf32> to vector<8xf32>
    %36 = vector.shape_cast %35 : vector<8xf32> to vector<8x1xf32>
    %37 = math.log %36 : vector<8x1xf32>
    %38 = vector.broadcast %37 : vector<8x1xf32> to vector<8x128xf32>
    %39 = arith.subf %33, %38 : vector<8x128xf32>
    %c0_25 = arith.constant 0 : index
    %c0_26 = arith.constant 0 : index
    %40 = vector.load %arg10[%c0_25, %c0_26] : memref<8x128xf32, #tpu.memory_space<vmem>>, vector<8x128xf32>
    tpu.vector_store %arg10[%c0_25, %c0_26], %39 {strides = array<i32>} : memref<8x128xf32, #tpu.memory_space<vmem>>, vector<8x128xf32>,
    return
  }
  func.func @transform_0(%arg0: i32) -> (i32, i32) {
    %c0_i32 = arith.constant 0 : i32
    %c0_i32_0 = arith.constant 0 : i32
    %c0_i32_1 = arith.constant 0 : i32
    return %c0_i32, %c0_i32_0 : i32, i32
  }
  func.func @transform_1(%arg0: i32) -> (i32, i32) {
    %c0_i32 = arith.constant 0 : i32
    %c0_i32_0 = arith.constant 0 : i32
    %c0_i32_1 = arith.constant 0 : i32
    return %c0_i32, %c0_i32_0 : i32, i32
  }
  func.func @transform_2(%arg0: i32) -> (i32, i32) {
    %c0_i32 = arith.constant 0 : i32
    %c0_i32_0 = arith.constant 0 : i32
    %c0_i32_1 = arith.constant 0 : i32
    return %c0_i32, %c0_i32_0 : i32, i32
  }
  func.func @transform_3(%arg0: i32) -> (i32, i32) {
    %c0_i32 = arith.constant 0 : i32
    %c0_i32_0 = arith.constant 0 : i32
    %c0_i32_1 = arith.constant 0 : i32
    return %c0_i32, %c0_i32_0 : i32, i32
  }
  func.func @transform_4(%arg0: i32) -> (i32, i32) {
    %c0_i32 = arith.constant 0 : i32
    %c0_i32_0 = arith.constant 0 : i32
    %c0_i32_1 = arith.constant 0 : i32
    return %c0_i32, %c0_i32_0 : i32, i32
  }
  func.func @transform_5(%arg0: i32) -> (i32, i32) {
    %c0_i32 = arith.constant 0 : i32
    %c0_i32_0 = arith.constant 0 : i32
    %c0_i32_1 = arith.constant 0 : i32
    return %c0_i32, %c0_i32_0 : i32, i32
  }
  func.func @transform_6(%arg0: i32) -> (i32, i32) {
    %c0_i32 = arith.constant 0 : i32
    %c0_i32_0 = arith.constant 0 : i32
    %c0_i32_1 = arith.constant 0 : i32
    return %c0_i32, %c0_i32_0 : i32, i32
  }
  func.func @transform_7(%arg0: i32) -> (i32, i32) {
    %c0_i32 = arith.constant 0 : i32
    %c0_i32_0 = arith.constant 0 : i32
    %c0_i32_1 = arith.constant 0 : i32
    return %c0_i32, %c0_i32_0 : i32, i32
  }
  func.func @transform_8(%arg0: i32) -> (i32, i32) {
    %c0_i32 = arith.constant 0 : i32
    %c0_i32_0 = arith.constant 0 : i32
    %c0_i32_1 = arith.constant 0 : i32
    return %c0_i32, %c0_i32_0 : i32, i32
  }
  func.func @transform_9(%arg0: i32) -> (i32, i32) {
    %c0_i32 = arith.constant 0 : i32
    %c0_i32_0 = arith.constant 0 : i32
    %c0_i32_1 = arith.constant 0 : i32
    return %c0_i32, %c0_i32_0 : i32, i32
  }
}

</mosaic_0001>

<bundles_post_ra>
// kernel: tpu_custom_call.1
= control target key start
LH: loop header
LB: loop body
LE: loop exit
PB: predicated region body
PF: predicated region fallthrough
CT: control target
= control target key end

     0   :  { %14 = vsyncpa [#allocation3], 0  ;;  %s2221_s0 = inlined_call_operand.hbm [shape: bf16[256,128], index: 0, kind: input, shape index: {}]   ;;  %s2222_s1 = inlined_call_operand.hbm [shape: bf16[256,256], index: 1, kind: input, shape index: {}]   ;;  %s2223_s2 = inlined_call_operand.hbm [shape: bf16[8,256], index: 2, kind: input, shape index: {}]   ;;  %s2224_s3 = inlined_call_operand.hbm [shape: bf16[128,128], index: 3, kind: input, shape index: {}]   ;;  %s2225_s4 = inlined_call_operand.vmem [shape: f32[1,128], index: 4, kind: input, shape index: {}]   ;;  %s2226_s5 = inlined_call_operand.hbm [shape: bf16[128,128], index: 5, kind: input, shape index: {}]   ;;  %s2227_s6 = inlined_call_operand.vmem [shape: f32[1,128], index: 6, kind: input, shape index: {}]   ;;  %s2228_s7 = inlined_call_operand.hbm [shape: f32[128,128], index: 7, kind: input, shape index: {}]   ;;  %s2229_s8 = inlined_call_operand.vmem [shape: f32[1,128], index: 8, kind: input, shape index: {}]   ;;  %s2230_s9 = inlined_call_operand.hbm [shape: f32[8,128], index: 9, kind: output, shape index: {}]  }
   0x1   :  { %15 = vsyncpa [#allocation6], 0 }
   0x2   :  { %16 = vsyncpa [#allocation9], 0 }
   0x3   :  { %17 = vsyncpa [#allocation12], 0 }
   0x4   :  { %18 = vsyncpa [#allocation4], 0  ;;  %s2000_s30 = smov [#allocation5]   ;;  %s1836_s13 = scalar_lea.hbm %s2222_s1, 4096 }
   0x5   :  { %s36_s10 = sshll.u32 %s2000_s30, 4  ;;  %p1837_p0 = scmp.ne.s32.totalorder %s2222_s1, %s1836_s13  ;;  %s37_s10 = int_to_ptr.vmem [resolvable:$true] %s36_s10 }
   0x6   :  { %p1840_p1 = scmp.lt.u32.totalorder %s1836_s13, %s2222_s1 }
   0x8   :  { %p1842_p2 = pnand %p1840_p1, %p1837_p0 }
   0xa   :  { %1845 = shalt.err (!%p1842_p2)
}
   0xb   :  { %s1846_s18 = scalar_lea.vmem %s37_s10, 4096  ;;  %p1851_p4 = scmp.lt.s32.totalorder %s37_s10, %s37_s10 }
   0xc   :  { %p1847_p3 = scmp.ne.s32.totalorder %s37_s10, %s1846_s18  ;;  %p1852_p5 = scmp.lt.s32.totalorder %s1846_s18, %s1846_s18 }
   0xe   :  { %p1853_p6 = por %p1852_p5, %p1851_p4 }
  0x10   :  { %p1854_p7 = pnand %p1853_p6, %p1847_p3 }
  0x12   :  { %1857 = shalt.err (!%p1854_p7)
}
  0x13   :  { %s2001_s19 = smov 128   ;;  %s2002_s20 = smov 8  }
  0x14   :  { %42 = dma.hbm_to_vmem [thread:$0]  %s2222_s1, 4096, %s37_s10, [#allocation6], %s2001_s19, %s2001_s19, %s2002_s20  }
  0x15   :  { %s2003_s23 = smov [#allocation8]   ;;  %s2004_s25 = smov [#allocation2]  }
  0x16   :  { %s58_s24 = sshll.u32 %s2003_s23, 4  ;;  %s24_s26 = sshll.u32 %s2004_s25, 4  ;;  %s59_s24 = int_to_ptr.vmem [resolvable:$true] %s58_s24  ;;  %s25_s26 = int_to_ptr.vmem [resolvable:$true] %s24_s26 }
  0x17   :  { %s1858_s29 = scalar_lea.hbm %s2224_s3, 1024 }
  0x18   :  { %p1859_p8 = scmp.ne.s32.totalorder %s2224_s3, %s1858_s29  ;;  %p1862_p9 = scmp.lt.u32.totalorder %s1858_s29, %s2224_s3 }
  0x1a   :  { %p1864_p10 = pnand %p1862_p9, %p1859_p8 }
  0x1c   :  { %1867 = shalt.err (!%p1864_p10)
}
  0x1d   :  { %s1868_s1 = scalar_lea.vmem %s59_s24, 1024  ;;  %p1873_p12 = scmp.lt.s32.totalorder %s59_s24, %s59_s24 }
  0x1e   :  { %p1869_p11 = scmp.ne.s32.totalorder %s59_s24, %s1868_s1  ;;  %p1874_p13 = scmp.lt.s32.totalorder %s1868_s1, %s1868_s1 }
  0x20   :  { %p1875_p0 = por %p1874_p13, %p1873_p12 }
  0x22   :  { %p1876_p1 = pnand %p1875_p0, %p1869_p11 }
  0x24   :  { %1879 = shalt.err (!%p1876_p1)
}
  0x25   :  { %s2005_s10 = smov 64   ;;  %s2006_s14 = smov 4  }
  0x26   :  { %64 = dma.hbm_to_vmem [thread:$0]  %s2224_s3, 1024, %s59_s24, [#allocation9], %s2005_s10, %s2005_s10, %s2006_s14  }
  0x27   :  { %s1880_s21 = scalar_lea.hbm %s2221_s0, 2048 }
  0x28   :  { %p1881_p2 = scmp.ne.s32.totalorder %s2221_s0, %s1880_s21  ;;  %p1884_p3 = scmp.lt.u32.totalorder %s1880_s21, %s2221_s0 }
  0x2a   :  { %p1886_p4 = pnand %p1884_p3, %p1881_p2 }
  0x2c   :  { %1889 = shalt.err (!%p1886_p4)
}
  0x2d   :  { %s1890_s28 = scalar_lea.vmem %s25_s26, 2048  ;;  %p1895_p6 = scmp.lt.s32.totalorder %s25_s26, %s25_s26 }
  0x2e   :  { %p1891_p5 = scmp.ne.s32.totalorder %s25_s26, %s1890_s28  ;;  %p1896_p7 = scmp.lt.s32.totalorder %s1890_s28, %s1890_s28 }
  0x30   :  { %p1897_p8 = por %p1896_p7, %p1895_p6 }
  0x32   :  { %p1898_p9 = pnand %p1897_p8, %p1891_p5 }
  0x34   :  { %1901 = shalt.err (!%p1898_p9)
}
  0x35   :  { %30 = dma.hbm_to_vmem [thread:$0]  %s2221_s0, 2048, %s25_s26, [#allocation3], %s2005_s10, %s2005_s10, %s2006_s14  }
  0x36   :  { %s2007_s29 = smov [#allocation7]   ;;  %s2008_s11 = smov [#allocation10]  }
  0x37   :  { %s49_s30 = sshll.u32 %s2007_s29, 4  ;;  %s72_s12 = sshll.u32 %s2008_s11, 4  ;;  %s50_s30 = int_to_ptr.vmem [resolvable:$true] %s49_s30  ;;  %s73_s12 = int_to_ptr.vmem [resolvable:$true] %s72_s12 }
  0x38   :  { %s1902_s15 = scalar_lea.hbm %s2223_s2, 128 }
  0x39   :  { %p1903_p10 = scmp.ne.s32.totalorder %s2223_s2, %s1902_s15  ;;  %p1906_p11 = scmp.lt.u32.totalorder %s1902_s15, %s2223_s2 }
  0x3b   :  { %p1908_p12 = pnand %p1906_p11, %p1903_p10 }
  0x3d   :  { %1911 = shalt.err (!%p1908_p12)
}
  0x3e   :  { %s1912_s0 = scalar_lea.vmem %s50_s30, 128  ;;  %p1917_p0 = scmp.lt.s32.totalorder %s50_s30, %s50_s30 }
  0x3f   :  { %p1913_p13 = scmp.ne.s32.totalorder %s50_s30, %s1912_s0  ;;  %p1918_p1 = scmp.lt.s32.totalorder %s1912_s0, %s1912_s0 }
  0x41   :  { %p1919_p2 = por %p1918_p1, %p1917_p0 }
  0x43   :  { %p1920_p3 = pnand %p1919_p2, %p1913_p13 }
  0x45   :  { %1923 = shalt.err (!%p1920_p3)
}
  0x46   :  { %52 = dma.hbm_to_vmem [thread:$0]  %s2223_s2, 128, %s50_s30, [#allocation6]  }
  0x47   :  { %s1924_s27 = scalar_lea.hbm %s2226_s5, 1024 }
  0x48   :  { %p1925_p4 = scmp.ne.s32.totalorder %s2226_s5, %s1924_s27  ;;  %p1928_p5 = scmp.lt.u32.totalorder %s1924_s27, %s2226_s5 }
  0x4a   :  { %p1930_p6 = pnand %p1928_p5, %p1925_p4 }
  0x4c   :  { %1933 = shalt.err (!%p1930_p6)
}
  0x4d   :  { %s1934_s11 = scalar_lea.vmem %s73_s12, 1024  ;;  %p1939_p8 = scmp.lt.s32.totalorder %s73_s12, %s73_s12 }
  0x4e   :  { %p1935_p7 = scmp.ne.s32.totalorder %s73_s12, %s1934_s11  ;;  %p1940_p9 = scmp.lt.s32.totalorder %s1934_s11, %s1934_s11 }
  0x50   :  { %p1941_p10 = por %p1940_p9, %p1939_p8 }
  0x52   :  { %p1942_p11 = pnand %p1941_p10, %p1935_p7 }
  0x54   :  { %1945 = shalt.err (!%p1942_p11)
}
  0x55   :  { %78 = dma.hbm_to_vmem [thread:$0]  %s2226_s5, 1024, %s73_s12, [#allocation9], %s2005_s10, %s2005_s10, %s2006_s14  }
  0x56   :  { %s2009_s13 = smov [#allocation11]   ;;  %s1946_s17 = scalar_lea.hbm %s2228_s7, 2048 }
  0x57   :  { %s86_s1 = sshll.u32 %s2009_s13, 4  ;;  %p1947_p12 = scmp.ne.s32.totalorder %s2228_s7, %s1946_s17  ;;  %s87_s1 = int_to_ptr.vmem [resolvable:$true] %s86_s1 }
  0x58   :  { %p1950_p13 = scmp.lt.u32.totalorder %s1946_s17, %s2228_s7 }
  0x5a   :  { %p1952_p0 = pnand %p1950_p13, %p1947_p12 }
  0x5c   :  { %1955 = shalt.err (!%p1952_p0)
}
  0x5d   :  { %s1956_s22 = scalar_lea.vmem %s87_s1, 2048  ;;  %p1961_p2 = scmp.lt.s32.totalorder %s87_s1, %s87_s1 }
  0x5e   :  { %p1957_p1 = scmp.ne.s32.totalorder %s87_s1, %s1956_s22  ;;  %p1962_p3 = scmp.lt.s32.totalorder %s1956_s22, %s1956_s22 }
  0x60   :  { %p1963_p4 = por %p1962_p3, %p1961_p2 }
  0x62   :  { %p1964_p5 = pnand %p1963_p4, %p1957_p1 }
  0x64   :  { %1967 = shalt.err (!%p1964_p5)
}
  0x65   :  { %92 = dma.hbm_to_vmem [thread:$0]  %s2228_s7, 2048, %s87_s1, [#allocation12], %s2001_s19, %s2001_s19, %s2002_s20  }
  0x66   :  { %1990 = dma.done.wait [#allocation3], 2048  }
  0x67   :  { %1991 = vsyncadd [#allocation3], 4294965248 }
  0x68   :  { %1992 = dma.done.wait [#allocation6], 4224  }
  0x69   :  { %1993 = vsyncadd [#allocation6], 4294963072 }
  0x6a   :  { %1994 = dma.done.wait [#allocation9], 2048  }
  0x6b   :  { %1995 = vsyncadd [#allocation9], 4294965248 }
  0x6c   :  { %1996 = dma.done.wait [#allocation12], 2048  }
  0x6d   :  { %1997 = vsyncadd [#allocation12], 4294965248  ;;  %v1750_v0 = vld [vmem:[#allocation8] sm:$0xff]   ;;  %v1751_v1 = vld [vmem:[#allocation8 + $0x8] sm:$0xff]   ;;  %vm2011_vm0 = vmmov 0  }
  0x6e   :  { %1581 = vmatprep.subr.bf16.mxu0 %v1750_v0  ;;  %v1752_v2 = vld [vmem:[#allocation8 + $0x10] sm:$0xff]   ;;  %v1753_v3 = vld [vmem:[#allocation8 + $0x18] sm:$0xff]   ;;  %v1754_v5 = vld [vmem:[#allocation8 + $0x20] sm:$0xff]  }
  0x6f   :  { %1582 = vmatpush3.bf16.msra.mxu0 %v1750_v0  ;;  %v1758_v4 = vld [vmem:[#allocation2] sm:$0xff]   ;;  %v1755_v6 = vld [vmem:[#allocation8 + $0x28] sm:$0xff]   ;;  %v1756_v7 = vld [vmem:[#allocation8 + $0x30] sm:$0xff]  }
  0x70   :  { %1583 = vmatprep.subr.bf16.mxu0 %v1751_v1  ;;  %1597 = vmatprep.mubr.bf16.mxu0 %v1758_v4  ;;  %v1757_v8 = vld [vmem:[#allocation8 + $0x38] sm:$0xff]   ;;  %v1759_v9 = vld [vmem:[#allocation2 + $0x8] sm:$0xff]   ;;  %v1760_v10 = vld [vmem:[#allocation2 + $0x10] sm:$0xff]  }
  0x71   :  { %v1761_v11 = vld [vmem:[#allocation2 + $0x18] sm:$0xff]   ;;  %v1762_v12 = vld [vmem:[#allocation2 + $0x20] sm:$0xff]   ;;  %v1763_v13 = vld [vmem:[#allocation2 + $0x28] sm:$0xff]  }
  0x72   :  { %v1764_v14 = vld [vmem:[#allocation2 + $0x30] sm:$0xff]   ;;  %v1765_v15 = vld [vmem:[#allocation2 + $0x38] sm:$0xff]   ;;  %v1766_v16 = vld [vmem:[#allocation2 + $0x40] sm:$0xff]  }
  0x73   :  { %1584 = vmatpush3.bf16.msra.mxu0 %v1751_v1  ;;  %v1767_v17 = vld [vmem:[#allocation2 + $0x48] sm:$0xff]   ;;  %v1768_v18 = vld [vmem:[#allocation2 + $0x50] sm:$0xff]   ;;  %v1769_v19 = vld [vmem:[#allocation2 + $0x58] sm:$0xff]  }
  0x74   :  { %1585 = vmatprep.subr.bf16.mxu0 %v1752_v2  ;;  %v1770_v20 = vld [vmem:[#allocation2 + $0x60] sm:$0xff]   ;;  %v1771_v21 = vld [vmem:[#allocation2 + $0x68] sm:$0xff]   ;;  %v1772_v22 = vld [vmem:[#allocation2 + $0x70] sm:$0xff]  }
  0x75   :  { %v1773_v23 = vld [vmem:[#allocation2 + $0x78] sm:$0xff]   ;;  %v1776_v24 = vld [vmem:[#allocation5 + $0x4] ss:$8 sps:$4 sm:$0xff]  }
  0x76   :  { %714 = vmatprep.mubr.bf16.mxu1 %v1776_v24  ;;  %v1794_v24 = vld [vmem:[#allocation5 + $0x60] ss:$8 sps:$4 sm:$0xff]  }
  0x77   :  { %1586 = vmatpush3.bf16.msra.mxu0 %v1752_v2 }
  0x78   :  { %1587 = vmatprep.subr.bf16.mxu0 %v1753_v3 }
  0x7b   :  { %1588 = vmatpush3.bf16.msra.mxu0 %v1753_v3 }
  0x7c   :  { %1589 = vmatprep.subr.bf16.mxu0 %v1754_v5 }
  0x7f   :  { %1590 = vmatpush3.bf16.msra.mxu0 %v1754_v5 }
  0x80   :  { %1591 = vmatprep.subr.bf16.mxu0 %v1755_v6 }
  0x83   :  { %1592 = vmatpush3.bf16.msra.mxu0 %v1755_v6 }
  0x84   :  { %1593 = vmatprep.subr.bf16.mxu0 %v1756_v7 }
  0x87   :  { %1594 = vmatpush3.bf16.msra.mxu0 %v1756_v7 }
  0x88   :  { %1595 = vmatprep.subr.bf16.mxu0 %v1757_v8 }
  0x8b   :  { %1596 = vmatpush3.bf16.msra.mxu0 %v1757_v8 }
  0x8e   :  { %1598 = vmatmul.mubr.bf16.vlgmr.msra.gmra.mrb[0].mxu0 %v1759_v9  ;;  %v1822_v9 = vld [vmem:[#allocation10] sm:$0xff]  }
  0x8f   :  { %1601 = vmatprep.mubr.bf16.mxu0 %v1760_v10  ;;  %v1823_v10 = vld [vmem:[#allocation10 + $0x8] sm:$0xff]   ;;  %1629 = vmatprep.subr.bf16.mxu0 %v1822_v9 }
  0x90   :  { %1630 = vmatpush3.bf16.msra.mxu0 %v1822_v9 }
  0x91   :  { %1631 = vmatprep.subr.bf16.mxu0 %v1823_v10 }
  0x94   :  { %1632 = vmatpush3.bf16.msra.mxu0 %v1823_v10 }
  0x96   :  { %1602 = vmatmul.mubr.bf16.gmra.mrb[4].mxu0 %v1761_v11  ;;  %v1774_v11 = vld [vmem:[#allocation5] ss:$8 sps:$4 sm:$0xff]  }
  0x97   :  { %1605 = vmatprep.mubr.bf16.mxu0 %v1762_v12  ;;  %v1824_v12 = vld [vmem:[#allocation10 + $0x10] sm:$0xff]  }
  0x98   :  { %1633 = vmatprep.subr.bf16.mxu0 %v1824_v12 }
  0x99   :  { %1634 = vmatpush3.bf16.msra.mxu0 %v1824_v12 }
  0x9e   :  { %1606 = vmatmul.mubr.bf16.gmra.mrb[8].mxu0 %v1763_v13  ;;  %v1777_v13 = vld [vmem:[#allocation5 + $0x14] ss:$8 sps:$4 sm:$0xff]  }
  0x9f   :  { %1609 = vmatprep.mubr.bf16.mxu0 %v1764_v14  ;;  %v1779_v14 = vld [vmem:[#allocation5 + $0x10] ss:$8 sps:$4 sm:$0xff]  }
  0xa6   :  { %1610 = vmatmul.mubr.bf16.gmra.mrb[12].mxu0 %v1765_v15  ;;  %v1780_v15 = vld [vmem:[#allocation5 + $0x24] ss:$8 sps:$4 sm:$0xff]  }
  0xa7   :  { %1613 = vmatprep.mubr.bf16.mxu0 %v1766_v16  ;;  %v1782_v16 = vld [vmem:[#allocation5 + $0x20] ss:$8 sps:$4 sm:$0xff]  }
  0xae   :  { %1614 = vmatmul.mubr.bf16.gmra.mrb[16].mxu0 %v1767_v17  ;;  %v1783_v17 = vld [vmem:[#allocation5 + $0x34] ss:$8 sps:$4 sm:$0xff]  }
  0xaf   :  { %1617 = vmatprep.mubr.bf16.mxu0 %v1768_v18  ;;  %v1785_v18 = vld [vmem:[#allocation5 + $0x30] ss:$8 sps:$4 sm:$0xff]  }
  0xb6   :  { %1618 = vmatmul.mubr.bf16.gmra.mrb[20].mxu0 %v1769_v19  ;;  %v1786_v19 = vld [vmem:[#allocation5 + $0x44] ss:$8 sps:$4 sm:$0xff]  }
  0xb7   :  { %1621 = vmatprep.mubr.bf16.mxu0 %v1770_v20  ;;  %v1788_v20 = vld [vmem:[#allocation5 + $0x40] ss:$8 sps:$4 sm:$0xff]  }
  0xbe   :  { %1622 = vmatmul.mubr.bf16.gmra.mrb[24].mxu0 %v1771_v21  ;;  %v1789_v21 = vld [vmem:[#allocation5 + $0x54] ss:$8 sps:$4 sm:$0xff]  }
  0xbf   :  { %1625 = vmatprep.mubr.bf16.mxu0 %v1772_v22  ;;  %v1791_v22 = vld [vmem:[#allocation5 + $0x50] ss:$8 sps:$4 sm:$0xff]  }
  0xc6   :  { %1626 = vmatmul.mubr.bf16.gmra.mrb[28].mxu0 %v1773_v23  ;;  %v1792_v23 = vld [vmem:[#allocation5 + $0x64] ss:$8 sps:$4 sm:$0xff]  }
 0x161   :  { %v1599_v25 = vpop.f32.mrb[0].mxu0 }
 0x162   :  { %v340_v26 = vpop.f32.mrb[1].mxu0 }
 0x163   :  { %v1600_v27 = vpop.f32.mrb[2].mxu0 }
 0x164   :  { %v500_v28 = vpack.c.bf16 %v1600_v27, %v1599_v25  ;;  %v343_v29 = vpop.f32.mrb[3].mxu0  ;;  %v1795_v25 = vld [vmem:[#allocation5 + $0x74] ss:$8 sps:$4 sm:$0xff]   ;;  %v1798_v27 = vld [vmem:[#allocation5 + $0x84] ss:$8 sps:$4 sm:$0xff]  }
 0x165   :  { %v499_v30 = vpack.c.bf16 %v343_v29, %v340_v26  ;;  %v1797_v26 = vld [vmem:[#allocation5 + $0x70] ss:$8 sps:$4 sm:$0xff]   ;;  %v1801_v29 = vld [vmem:[#allocation5 + $0x94] ss:$8 sps:$4 sm:$0xff]  }
 0x169   :  { %v1603_v31 = vpop.f32.mrb[4].mxu0 }
 0x16a   :  { %v356_v32 = vpop.f32.mrb[5].mxu0 }
 0x16b   :  { %v1604_v33 = vpop.f32.mrb[6].mxu0 }
 0x16c   :  { %v502_v34 = vpack.c.bf16 %v1604_v33, %v1603_v31  ;;  %v359_v35 = vpop.f32.mrb[7].mxu0  ;;  %v1804_v31 = vld [vmem:[#allocation5 + $0xa4] ss:$8 sps:$4 sm:$0xff]   ;;  %v1807_v33 = vld [vmem:[#allocation5 + $0xb4] ss:$8 sps:$4 sm:$0xff]  }
 0x16d   :  { %v501_v36 = vpack.c.bf16 %v359_v35, %v356_v32  ;;  %v1806_v32 = vld [vmem:[#allocation5 + $0xa0] ss:$8 sps:$4 sm:$0xff]   ;;  %v1809_v35 = vld [vmem:[#allocation5 + $0xb0] ss:$8 sps:$4 sm:$0xff]  }
 0x171   :  { %v1607_v37 = vpop.f32.mrb[8].mxu0 }
 0x172   :  { %v372_v38 = vpop.f32.mrb[9].mxu0 }
 0x173   :  { %v1608_v39 = vpop.f32.mrb[10].mxu0 }
 0x174   :  { %v504_v40 = vpack.c.bf16 %v1608_v39, %v1607_v37  ;;  %v375_v41 = vpop.f32.mrb[11].mxu0  ;;  %v1826_v37 = vld [vmem:[#allocation10 + $0x20] sm:$0xff]  }
 0x175   :  { %v503_v42 = vpack.c.bf16 %v375_v41, %v372_v38  ;;  %v1827_v38 = vld [vmem:[#allocation10 + $0x28] sm:$0xff]   ;;  %v1812_v39 = vld [vmem:[#allocation5 + $0xc0] ss:$8 sps:$4 sm:$0xff]   ;;  %v1828_v41 = vld [vmem:[#allocation10 + $0x30] sm:$0xff]  }
 0x179   :  { %v1611_v43 = vpop.f32.mrb[12].mxu0 }
 0x17a   :  { %v388_v44 = vpop.f32.mrb[13].mxu0 }
 0x17b   :  { %v1612_v45 = vpop.f32.mrb[14].mxu0 }
 0x17c   :  { %v506_v46 = vpack.c.bf16 %v1612_v45, %v1611_v43  ;;  %v391_v47 = vpop.f32.mrb[15].mxu0  ;;  %v1815_v43 = vld [vmem:[#allocation5 + $0xd0] ss:$8 sps:$4 sm:$0xff]   ;;  %v1818_v45 = vld [vmem:[#allocation5 + $0xe0] ss:$8 sps:$4 sm:$0xff]  }
 0x17d   :  { %v505_v48 = vpack.c.bf16 %v391_v47, %v388_v44  ;;  %v1816_v44 = vld [vmem:[#allocation5 + $0xe4] ss:$8 sps:$4 sm:$0xff]   ;;  %v1821_v47 = vld [vmem:[#allocation5 + $0xf0] ss:$8 sps:$4 sm:$0xff]  }
 0x181   :  { %v1615_v49 = vpop.f32.mrb[16].mxu0 }
 0x182   :  { %v404_v50 = vpop.f32.mrb[17].mxu0 }
 0x183   :  { %v1616_v51 = vpop.f32.mrb[18].mxu0 }
 0x184   :  { %v508_v52 = vpack.c.bf16 %v1616_v51, %v1615_v49  ;;  %v407_v53 = vpop.f32.mrb[19].mxu0  ;;  %v2154_v49 = vld [vmem:[%s2225_s4] ss:$0 sm:$0xff] }
 0x185   :  { %v507_v54 = vpack.c.bf16 %v407_v53, %v404_v50 }
 0x187   :  { %1406 = vmatprep.subr.bf16.mxu1 %v507_v54 }
 0x188   :  { %1407 = vmatpush3.bf16.msra.mxu1 %v499_v30  ;;  %v1803_v30 = vld [vmem:[#allocation5 + $0x90] ss:$8 sps:$4 sm:$0xff]  }
 0x189   :  { %v1619_v55 = vpop.f32.mrb[20].mxu0  ;;  %1408 = vmatprep.subr.bf16.mxu1 %v508_v52 }
 0x18a   :  { %v420_v56 = vpop.f32.mrb[21].mxu0 }
 0x18b   :  { %v1620_v57 = vpop.f32.mrb[22].mxu0 }
 0x18c   :  { %v510_v58 = vpack.c.bf16 %v1620_v57, %v1619_v55  ;;  %v423_v59 = vpop.f32.mrb[23].mxu0  ;;  %1409 = vmatpush3.bf16.msra.mxu1 %v500_v28  ;;  %v1800_v28 = vld [vmem:[#allocation5 + $0x80] ss:$8 sps:$4 sm:$0xff]  }
 0x18d   :  { %v509_v60 = vpack.c.bf16 %v423_v59, %v420_v56 }
 0x18f   :  { %1410 = vmatprep.subr.bf16.mxu1 %v509_v60 }
 0x190   :  { %1411 = vmatpush3.bf16.msra.mxu1 %v501_v36  ;;  %v1810_v36 = vld [vmem:[#allocation5 + $0xc4] ss:$8 sps:$4 sm:$0xff]  }
 0x191   :  { %v1623_v61 = vpop.f32.mrb[24].mxu0  ;;  %1412 = vmatprep.subr.bf16.mxu1 %v510_v58 }
 0x192   :  { %v436_v62 = vpop.f32.mrb[25].mxu0 }
 0x193   :  { %v1624_v63 = vpop.f32.mrb[26].mxu0 }
 0x194   :  { %v512_v0 = vpack.c.bf16 %v1624_v63, %v1623_v61  ;;  %v439_v1 = vpop.f32.mrb[27].mxu0  ;;  %1413 = vmatpush3.bf16.msra.mxu1 %v502_v34  ;;  %v1825_v34 = vld [vmem:[#allocation10 + $0x18] sm:$0xff]  }
 0x195   :  { %v511_v2 = vpack.c.bf16 %v439_v1, %v436_v62  ;;  %1635 = vmatprep.subr.bf16.mxu0 %v1825_v34 }
 0x196   :  { %1636 = vmatpush3.bf16.msra.mxu0 %v1825_v34 }
 0x197   :  { %1414 = vmatprep.subr.bf16.mxu1 %v511_v2  ;;  %1637 = vmatprep.subr.bf16.mxu0 %v1826_v37 }
 0x198   :  { %1415 = vmatpush3.bf16.msra.mxu1 %v503_v42  ;;  %v1829_v42 = vld [vmem:[#allocation10 + $0x38] sm:$0xff]  }
 0x199   :  { %v1627_v3 = vpop.f32.mrb[28].mxu0  ;;  %1416 = vmatprep.subr.bf16.mxu1 %v512_v0 }
 0x19a   :  { %v452_v4 = vpop.f32.mrb[29].mxu0  ;;  %1638 = vmatpush3.bf16.msra.mxu0 %v1826_v37 }
 0x19b   :  { %v1628_v5 = vpop.f32.mrb[30].mxu0  ;;  %1639 = vmatprep.subr.bf16.mxu0 %v1827_v38 }
 0x19c   :  { %v514_v6 = vpack.c.bf16 %v1628_v5, %v1627_v3  ;;  %v455_v7 = vpop.f32.mrb[31].mxu0  ;;  %1417 = vmatpush3.bf16.msra.mxu1 %v504_v40  ;;  %v1813_v40 = vld [vmem:[#allocation5 + $0xd4] ss:$8 sps:$4 sm:$0xff]  }
 0x19d   :  { %v513_v8 = vpack.c.bf16 %v455_v7, %v452_v4 }
 0x19e   :  { %1640 = vmatpush3.bf16.msra.mxu0 %v1827_v38 }
 0x19f   :  { %1418 = vmatprep.subr.bf16.mxu1 %v513_v8  ;;  %1641 = vmatprep.subr.bf16.mxu0 %v1828_v41 }
 0x1a0   :  { %1419 = vmatpush3.bf16.msra.mxu1 %v505_v48 }
 0x1a1   :  { %1420 = vmatprep.subr.bf16.mxu1 %v514_v6 }
 0x1a2   :  { %1642 = vmatpush3.bf16.msra.mxu0 %v1828_v41 }
 0x1a3   :  { %1643 = vmatprep.subr.bf16.mxu0 %v1829_v42 }
 0x1a4   :  { %1421 = vmatpush3.bf16.msra.mxu1 %v506_v46  ;;  %v1819_v46 = vld [vmem:[#allocation5 + $0xf4] ss:$8 sps:$4 sm:$0xff]  }
 0x1a6   :  { %1644 = vmatpush3.bf16.msra.mxu0 %v1829_v42 }
 0x1a7   :  { %715 = vmatmul.mubr.bf16.vlgmr.msra.gmra.mrb[0].mxu1 %v1774_v11 }
 0x1a8   :  { %722 = vmatprep.mubr.bf16.mxu1 %v1777_v13 }
 0x1af   :  { %723 = vmatmul.mubr.bf16.gmra.mrb[4].mxu1 %v1779_v14 }
 0x1b0   :  { %730 = vmatprep.mubr.bf16.mxu1 %v1780_v15 }
 0x1b7   :  { %731 = vmatmul.mubr.bf16.gmra.mrb[8].mxu1 %v1782_v16 }
 0x1b8   :  { %738 = vmatprep.mubr.bf16.mxu1 %v1783_v17 }
 0x1bf   :  { %739 = vmatmul.mubr.bf16.gmra.mrb[12].mxu1 %v1785_v18 }
 0x1c0   :  { %746 = vmatprep.mubr.bf16.mxu1 %v1786_v19 }
 0x1c7   :  { %747 = vmatmul.mubr.bf16.gmra.mrb[16].mxu1 %v1788_v20 }
 0x1c8   :  { %754 = vmatprep.mubr.bf16.mxu1 %v1789_v21 }
 0x1cf   :  { %755 = vmatmul.mubr.bf16.gmra.mrb[20].mxu1 %v1791_v22 }
 0x1d0   :  { %762 = vmatprep.mubr.bf16.mxu1 %v1792_v23 }
 0x1d7   :  { %763 = vmatmul.mubr.bf16.gmra.mrb[24].mxu1 %v1794_v24 }
 0x1d8   :  { %770 = vmatprep.mubr.bf16.mxu1 %v1795_v25 }
 0x1df   :  { %771 = vmatmul.mubr.bf16.gmra.mrb[28].mxu1 %v1797_v26 }
 0x1e0   :  { %778 = vmatprep.mubr.bf16.mxu1 %v1798_v27 }
 0x1e7   :  { %779 = vmatmul.mubr.bf16.gmra.mrb[32].mxu1 %v1800_v28 }
 0x1e8   :  { %786 = vmatprep.mubr.bf16.mxu1 %v1801_v29 }
 0x1ef   :  { %787 = vmatmul.mubr.bf16.gmra.mrb[36].mxu1 %v1803_v30 }
 0x1f0   :  { %794 = vmatprep.mubr.bf16.mxu1 %v1804_v31 }
 0x1f7   :  { %795 = vmatmul.mubr.bf16.gmra.mrb[40].mxu1 %v1806_v32 }
 0x1f8   :  { %802 = vmatprep.mubr.bf16.mxu1 %v1807_v33 }
 0x1ff   :  { %803 = vmatmul.mubr.bf16.gmra.mrb[44].mxu1 %v1809_v35 }
 0x200   :  { %810 = vmatprep.mubr.bf16.mxu1 %v1810_v36 }
 0x207   :  { %811 = vmatmul.mubr.bf16.gmra.mrb[48].mxu1 %v1812_v39 }
 0x208   :  { %818 = vmatprep.mubr.bf16.mxu1 %v1813_v40 }
 0x20f   :  { %819 = vmatmul.mubr.bf16.gmra.mrb[52].mxu1 %v1815_v43 }
 0x210   :  { %826 = vmatprep.mubr.bf16.mxu1 %v1816_v44 }
 0x217   :  { %827 = vmatmul.mubr.bf16.gmra.mrb[56].mxu1 %v1818_v45 }
 0x218   :  { %834 = vmatprep.mubr.bf16.mxu1 %v1819_v46 }
 0x21f   :  { %835 = vmatmul.mubr.bf16.gmra.mrb[60].mxu1 %v1821_v47 }
 0x27a   :  { %v1422_v48 = vpop.f32.mrb[0].mxu1 }
 0x27b   :  { %v1423_v50 = vpop.f32.mrb[1].mxu1 }
 0x27c   :  { %v1424_v51 = vadd.f32 %v1423_v50, %v1422_v48  ;;  %v1425_v52 = vpop.f32.mrb[2].mxu1 }
 0x27d   :  { %v1426_v53 = vpop.f32.mrb[3].mxu1 }
 0x27e   :  { %v717_v54 = vadd.f32 %v1424_v51, %v2154_v49  ;;  %v1427_v55 = vadd.f32 %v1426_v53, %v1425_v52 }
 0x280   :  { %v720_v56 = vadd.f32 %v1427_v55, %v2154_v49  ;;  %v843_v57 = vmax.f32 %v717_v54, 0.0 }
 0x282   :  { %v844_v58 = vmax.f32 %v720_v56, 0.0  ;;  %v1428_v59 = vpop.f32.mrb[4].mxu1 }
 0x283   :  { %v1429_v60 = vpop.f32.mrb[5].mxu1 }
 0x284   :  { %v1430_v61 = vadd.f32 %v1429_v60, %v1428_v59  ;;  %v1431_v62 = vpop.f32.mrb[6].mxu1  ;;  %v875_v63 = vpack.c.bf16 %v844_v58, %v843_v57 }
 0x285   :  { %v1432_v0 = vpop.f32.mrb[7].mxu1 }
 0x286   :  { %v725_v1 = vadd.f32 %v1430_v61, %v2154_v49  ;;  %v1433_v2 = vadd.f32 %v1432_v0, %v1431_v62  ;;  %1645 = vmatprep.mubr.bf16.mxu0 %v875_v63 }
 0x288   :  { %v728_v3 = vadd.f32 %v1433_v2, %v2154_v49  ;;  %v845_v4 = vmax.f32 %v725_v1, 0.0 }
 0x28a   :  { %v846_v5 = vmax.f32 %v728_v3, 0.0  ;;  %v1434_v6 = vpop.f32.mrb[8].mxu1 }
 0x28b   :  { %v1435_v7 = vpop.f32.mrb[9].mxu1 }
 0x28c   :  { %v876_v8 = vpack.c.bf16 %v846_v5, %v845_v4  ;;  %v1436_v9 = vadd.f32 %v1435_v7, %v1434_v6  ;;  %v1437_v10 = vpop.f32.mrb[10].mxu1 }
 0x28d   :  { %v1438_v11 = vpop.f32.mrb[11].mxu1 }
 0x28e   :  { %v733_v12 = vadd.f32 %v1436_v9, %v2154_v49  ;;  %v1439_v13 = vadd.f32 %v1438_v11, %v1437_v10  ;;  %1646 = vmatmul.mubr.bf16.vlgmr.msra.gmra.mrb[32].mxu0 %v876_v8 }
 0x290   :  { %v736_v14 = vadd.f32 %v1439_v13, %v2154_v49  ;;  %v847_v15 = vmax.f32 %v733_v12, 0.0 }
 0x292   :  { %v848_v16 = vmax.f32 %v736_v14, 0.0  ;;  %v1440_v17 = vpop.f32.mrb[12].mxu1 }
 0x293   :  { %v1441_v18 = vpop.f32.mrb[13].mxu1 }
 0x294   :  { %v1442_v19 = vadd.f32 %v1441_v18, %v1440_v17  ;;  %v1443_v20 = vpop.f32.mrb[14].mxu1  ;;  %v877_v21 = vpack.c.bf16 %v848_v16, %v847_v15 }
 0x295   :  { %v1444_v22 = vpop.f32.mrb[15].mxu1 }
 0x296   :  { %v741_v23 = vadd.f32 %v1442_v19, %v2154_v49  ;;  %v1445_v24 = vadd.f32 %v1444_v22, %v1443_v20  ;;  %1649 = vmatprep.mubr.bf16.mxu0 %v877_v21 }
 0x298   :  { %v744_v25 = vadd.f32 %v1445_v24, %v2154_v49  ;;  %v849_v26 = vmax.f32 %v741_v23, 0.0 }
 0x29a   :  { %v850_v27 = vmax.f32 %v744_v25, 0.0  ;;  %v1446_v28 = vpop.f32.mrb[16].mxu1 }
 0x29b   :  { %v1447_v29 = vpop.f32.mrb[17].mxu1 }
 0x29c   :  { %v1448_v30 = vadd.f32 %v1447_v29, %v1446_v28  ;;  %v1449_v31 = vpop.f32.mrb[18].mxu1  ;;  %v878_v32 = vpack.c.bf16 %v850_v27, %v849_v26 }
 0x29d   :  { %v1450_v33 = vpop.f32.mrb[19].mxu1 }
 0x29e   :  { %v749_v34 = vadd.f32 %v1448_v30, %v2154_v49  ;;  %v1451_v35 = vadd.f32 %v1450_v33, %v1449_v31  ;;  %1650 = vmatmul.mubr.bf16.gmra.mrb[36].mxu0 %v878_v32 }
 0x2a0   :  { %v752_v36 = vadd.f32 %v1451_v35, %v2154_v49  ;;  %v851_v37 = vmax.f32 %v749_v34, 0.0 }
 0x2a2   :  { %v852_v38 = vmax.f32 %v752_v36, 0.0  ;;  %v1452_v39 = vpop.f32.mrb[20].mxu1 }
 0x2a3   :  { %v1453_v40 = vpop.f32.mrb[21].mxu1 }
 0x2a4   :  { %v1454_v41 = vadd.f32 %v1453_v40, %v1452_v39  ;;  %v1455_v42 = vpop.f32.mrb[22].mxu1  ;;  %v879_v43 = vpack.c.bf16 %v852_v38, %v851_v37 }
 0x2a5   :  { %v1456_v44 = vpop.f32.mrb[23].mxu1 }
 0x2a6   :  { %v757_v45 = vadd.f32 %v1454_v41, %v2154_v49  ;;  %v1457_v46 = vadd.f32 %v1456_v44, %v1455_v42  ;;  %1653 = vmatprep.mubr.bf16.mxu0 %v879_v43 }
 0x2a8   :  { %v760_v47 = vadd.f32 %v1457_v46, %v2154_v49  ;;  %v853_v48 = vmax.f32 %v757_v45, 0.0 }
 0x2aa   :  { %v854_v50 = vmax.f32 %v760_v47, 0.0  ;;  %v1458_v51 = vpop.f32.mrb[24].mxu1 }
 0x2ab   :  { %v1459_v52 = vpop.f32.mrb[25].mxu1 }
 0x2ac   :  { %v1460_v53 = vadd.f32 %v1459_v52, %v1458_v51  ;;  %v1461_v54 = vpop.f32.mrb[26].mxu1  ;;  %v880_v55 = vpack.c.bf16 %v854_v50, %v853_v48 }
 0x2ad   :  { %v1462_v56 = vpop.f32.mrb[27].mxu1 }
 0x2ae   :  { %v765_v57 = vadd.f32 %v1460_v53, %v2154_v49  ;;  %v1463_v58 = vadd.f32 %v1462_v56, %v1461_v54  ;;  %1654 = vmatmul.mubr.bf16.gmra.mrb[40].mxu0 %v880_v55 }
 0x2b0   :  { %v768_v59 = vadd.f32 %v1463_v58, %v2154_v49  ;;  %v855_v60 = vmax.f32 %v765_v57, 0.0 }
 0x2b2   :  { %v856_v61 = vmax.f32 %v768_v59, 0.0  ;;  %v1464_v62 = vpop.f32.mrb[28].mxu1 }
 0x2b3   :  { %v1465_v63 = vpop.f32.mrb[29].mxu1 }
 0x2b4   :  { %v1466_v0 = vadd.f32 %v1465_v63, %v1464_v62  ;;  %v1467_v1 = vpop.f32.mrb[30].mxu1  ;;  %v881_v2 = vpack.c.bf16 %v856_v61, %v855_v60 }
 0x2b5   :  { %v1468_v3 = vpop.f32.mrb[31].mxu1 }
 0x2b6   :  { %v773_v4 = vadd.f32 %v1466_v0, %v2154_v49  ;;  %v1469_v5 = vadd.f32 %v1468_v3, %v1467_v1  ;;  %1657 = vmatprep.mubr.bf16.mxu0 %v881_v2 }
 0x2b8   :  { %v776_v6 = vadd.f32 %v1469_v5, %v2154_v49  ;;  %v857_v7 = vmax.f32 %v773_v4, 0.0 }
 0x2ba   :  { %v858_v8 = vmax.f32 %v776_v6, 0.0  ;;  %v1470_v9 = vpop.f32.mrb[32].mxu1 }
 0x2bb   :  { %v1471_v10 = vpop.f32.mrb[33].mxu1 }
 0x2bc   :  { %v1472_v11 = vadd.f32 %v1471_v10, %v1470_v9  ;;  %v1473_v12 = vpop.f32.mrb[34].mxu1  ;;  %v882_v13 = vpack.c.bf16 %v858_v8, %v857_v7 }
 0x2bd   :  { %v1474_v14 = vpop.f32.mrb[35].mxu1 }
 0x2be   :  { %v781_v15 = vadd.f32 %v1472_v11, %v2154_v49  ;;  %v1475_v16 = vadd.f32 %v1474_v14, %v1473_v12  ;;  %1658 = vmatmul.mubr.bf16.gmra.mrb[44].mxu0 %v882_v13 }
 0x2c0   :  { %v784_v17 = vadd.f32 %v1475_v16, %v2154_v49  ;;  %v859_v18 = vmax.f32 %v781_v15, 0.0 }
 0x2c2   :  { %v860_v19 = vmax.f32 %v784_v17, 0.0  ;;  %v1476_v20 = vpop.f32.mrb[36].mxu1 }
 0x2c3   :  { %v1477_v21 = vpop.f32.mrb[37].mxu1 }
 0x2c4   :  { %v1478_v22 = vadd.f32 %v1477_v21, %v1476_v20  ;;  %v1479_v23 = vpop.f32.mrb[38].mxu1  ;;  %v883_v24 = vpack.c.bf16 %v860_v19, %v859_v18 }
 0x2c5   :  { %v1480_v25 = vpop.f32.mrb[39].mxu1 }
 0x2c6   :  { %v789_v26 = vadd.f32 %v1478_v22, %v2154_v49  ;;  %v1481_v27 = vadd.f32 %v1480_v25, %v1479_v23  ;;  %1661 = vmatprep.mubr.bf16.mxu0 %v883_v24 }
 0x2c8   :  { %v792_v28 = vadd.f32 %v1481_v27, %v2154_v49  ;;  %v861_v29 = vmax.f32 %v789_v26, 0.0 }
 0x2ca   :  { %v862_v30 = vmax.f32 %v792_v28, 0.0  ;;  %v1482_v31 = vpop.f32.mrb[40].mxu1 }
 0x2cb   :  { %v1483_v32 = vpop.f32.mrb[41].mxu1 }
 0x2cc   :  { %v1484_v33 = vadd.f32 %v1483_v32, %v1482_v31  ;;  %v1485_v34 = vpop.f32.mrb[42].mxu1  ;;  %v884_v35 = vpack.c.bf16 %v862_v30, %v861_v29 }
 0x2cd   :  { %v1486_v36 = vpop.f32.mrb[43].mxu1 }
 0x2ce   :  { %v797_v37 = vadd.f32 %v1484_v33, %v2154_v49  ;;  %v1487_v38 = vadd.f32 %v1486_v36, %v1485_v34  ;;  %1662 = vmatmul.mubr.bf16.gmra.mrb[48].mxu0 %v884_v35  ;;  %v2188_v35 = vld [vmem:[#allocation7] sm:$0xff] }
 0x2cf   :  { %v1380_v36 = vcombine.high %v2188_v35, %v2188_v35 }
 0x2d0   :  { %v800_v39 = vadd.f32 %v1487_v38, %v2154_v49  ;;  %v863_v40 = vmax.f32 %v797_v37, 0.0  ;;  %v1187_v37 = vld [vmem:[#allocation11] sm:$0xff]  ;;  %v1188_v38 = vld [vmem:[#allocation11 + $0x8] sm:$0xff] }
 0x2d2   :  { %v864_v41 = vmax.f32 %v800_v39, 0.0  ;;  %v1488_v42 = vpop.f32.mrb[44].mxu1  ;;  %v1189_v39 = vld [vmem:[#allocation11 + $0x10] sm:$0xff] }
 0x2d3   :  { %v1489_v43 = vpop.f32.mrb[45].mxu1 }
 0x2d4   :  { %v1490_v44 = vadd.f32 %v1489_v43, %v1488_v42  ;;  %v1491_v45 = vpop.f32.mrb[46].mxu1  ;;  %v885_v46 = vpack.c.bf16 %v864_v41, %v863_v40  ;;  %v2010_v40 = vmov 0.0|0.0   ;;  %v1713_v41 = vpack.c.bf16 %v1188_v38, %v1187_v37  ;;  %v1190_v42 = vld [vmem:[#allocation11 + $0x18] sm:$0xff] }
 0x2d5   :  { %v1492_v47 = vpop.f32.mrb[47].mxu1  ;;  %1712 = vmatprep.subr.bf16.mxu1 %v2010_v40 }
 0x2d6   :  { %v805_v48 = vadd.f32 %v1490_v44, %v2154_v49  ;;  %v1493_v50 = vadd.f32 %v1492_v47, %v1491_v45  ;;  %1665 = vmatprep.mubr.bf16.mxu0 %v885_v46  ;;  %1714 = vmatpush3.bf16.msra.mxu1 %v1713_v41  ;;  %v1716_v44 = vpack.c.bf16 %v1190_v42, %v1189_v39  ;;  %v1191_v46 = vld [vmem:[#allocation11 + $0x20] sm:$0xff]  ;;  %v1192_v47 = vld [vmem:[#allocation11 + $0x28] sm:$0xff] }
 0x2d7   :  { %1715 = vmatprep.subr.bf16.mxu1 %v2010_v40 }
 0x2d8   :  { %v808_v51 = vadd.f32 %v1493_v50, %v2154_v49  ;;  %v865_v52 = vmax.f32 %v805_v48, 0.0 }
 0x2da   :  { %v866_v53 = vmax.f32 %v808_v51, 0.0  ;;  %v1494_v54 = vpop.f32.mrb[48].mxu1  ;;  %1717 = vmatpush3.bf16.msra.mxu1 %v1716_v44 }
 0x2db   :  { %v1495_v55 = vpop.f32.mrb[49].mxu1  ;;  %1718 = vmatprep.subr.bf16.mxu1 %v2010_v40 }
 0x2dc   :  { %v1496_v56 = vadd.f32 %v1495_v55, %v1494_v54  ;;  %v1497_v57 = vpop.f32.mrb[50].mxu1  ;;  %v886_v58 = vpack.c.bf16 %v866_v53, %v865_v52  ;;  %v1719_v52 = vpack.c.bf16 %v1192_v47, %v1191_v46  ;;  %v1193_v53 = vld [vmem:[#allocation11 + $0x30] sm:$0xff]  ;;  %v1194_v54 = vld [vmem:[#allocation11 + $0x38] sm:$0xff]  ;;  %v1379_v46 = vcombine.low %v2188_v35, %v2188_v35 }
 0x2dd   :  { %v1498_v59 = vpop.f32.mrb[51].mxu1  ;;  %v1722_v55 = vpack.c.bf16 %v1194_v54, %v1193_v53  ;;  %v2012_v47 = vmov 0.0   ;;  %v1381_v35 = vld [vmem:[%s2229_s8] ss:$0 sm:$0xff] }
 0x2de   :  { %v813_v60 = vadd.f32 %v1496_v56, %v2154_v49  ;;  %v1499_v61 = vadd.f32 %v1498_v59, %v1497_v57  ;;  %1666 = vmatmul.mubr.bf16.gmra.mrb[52].mxu0 %v886_v58  ;;  %1720 = vmatpush3.bf16.msra.mxu1 %v1719_v52  ;;  %v1195_v56 = vld [vmem:[#allocation11 + $0x40] sm:$0xff]  ;;  %v1196_v57 = vld [vmem:[#allocation11 + $0x48] sm:$0xff]  ;;  %v1197_v59 = vld [vmem:[#allocation11 + $0x50] sm:$0xff] }
 0x2df   :  { %1721 = vmatprep.subr.bf16.mxu1 %v2010_v40  ;;  %v1725_v58 = vpack.c.bf16 %v1196_v57, %v1195_v56  ;;  %1709 = vmatprep.mubr.msk.f32.mxu1 %vm2011_vm0, %v2012_v47  ;;  %v1280_v56 = vlaneseq }
 0x2e0   :  { %v816_v62 = vadd.f32 %v1499_v61, %v2154_v49  ;;  %v867_v63 = vmax.f32 %v813_v60, 0.0  ;;  %v1198_v60 = vld [vmem:[#allocation11 + $0x58] sm:$0xff] }
 0x2e1   :  { %v1281_v57 = vand.u32 127, %v1280_v56 }
 0x2e2   :  { %v868_v0 = vmax.f32 %v816_v62, 0.0  ;;  %v1500_v1 = vpop.f32.mrb[52].mxu1  ;;  %1723 = vmatpush3.bf16.msra.mxu1 %v1722_v55 }
 0x2e3   :  { %v1501_v2 = vpop.f32.mrb[53].mxu1  ;;  %1724 = vmatprep.subr.bf16.mxu1 %v2010_v40  ;;  %vm1282_vm1 = vcmp.lt.s32.totalorder %v1281_v57, 8 }
 0x2e4   :  { %v1502_v3 = vadd.f32 %v1501_v2, %v1500_v1  ;;  %v1503_v4 = vpop.f32.mrb[54].mxu1  ;;  %v887_v5 = vpack.c.bf16 %v868_v0, %v867_v63  ;;  %v1728_v63 = vpack.c.bf16 %v1198_v60, %v1197_v59  ;;  %v1199_v1 = vld [vmem:[#allocation11 + $0x60] sm:$0xff]  ;;  %v1200_v2 = vld [vmem:[#allocation11 + $0x68] sm:$0xff] }
 0x2e5   :  { %v1504_v6 = vpop.f32.mrb[55].mxu1 }
 0x2e6   :  { %v821_v7 = vadd.f32 %v1502_v3, %v2154_v49  ;;  %v1505_v8 = vadd.f32 %v1504_v6, %v1503_v4  ;;  %1669 = vmatprep.mubr.bf16.mxu0 %v887_v5  ;;  %1726 = vmatpush3.bf16.msra.mxu1 %v1725_v58  ;;  %v1731_v6 = vpack.c.bf16 %v1200_v2, %v1199_v1 }
 0x2e7   :  { %1727 = vmatprep.subr.bf16.mxu1 %v2010_v40 }
 0x2e8   :  { %v824_v9 = vadd.f32 %v1505_v8, %v2154_v49  ;;  %v869_v10 = vmax.f32 %v821_v7, 0.0  ;;  %v1201_v7 = vld [vmem:[#allocation11 + $0x70] sm:$0xff]  ;;  %v1202_v8 = vld [vmem:[#allocation11 + $0x78] sm:$0xff] }
 0x2ea   :  { %v870_v11 = vmax.f32 %v824_v9, 0.0  ;;  %v1506_v12 = vpop.f32.mrb[56].mxu1  ;;  %1729 = vmatpush3.bf16.msra.mxu1 %v1728_v63  ;;  %v1734_v9 = vpack.c.bf16 %v1202_v8, %v1201_v7 }
 0x2eb   :  { %v1507_v13 = vpop.f32.mrb[57].mxu1  ;;  %1730 = vmatprep.subr.bf16.mxu1 %v2010_v40 }
 0x2ec   :  { %v1508_v14 = vadd.f32 %v1507_v13, %v1506_v12  ;;  %v1509_v15 = vpop.f32.mrb[58].mxu1  ;;  %v888_v16 = vpack.c.bf16 %v870_v11, %v869_v10 }
 0x2ed   :  { %v1510_v17 = vpop.f32.mrb[59].mxu1 }
 0x2ee   :  { %v829_v18 = vadd.f32 %v1508_v14, %v2154_v49  ;;  %v1511_v19 = vadd.f32 %v1510_v17, %v1509_v15  ;;  %1670 = vmatmul.mubr.bf16.gmra.mrb[56].mxu0 %v888_v16  ;;  %1732 = vmatpush3.bf16.msra.mxu1 %v1731_v6 }
 0x2ef   :  { %1733 = vmatprep.subr.bf16.mxu1 %v2010_v40 }
 0x2f0   :  { %v832_v20 = vadd.f32 %v1511_v19, %v2154_v49  ;;  %v871_v21 = vmax.f32 %v829_v18, 0.0 }
 0x2f2   :  { %v872_v22 = vmax.f32 %v832_v20, 0.0  ;;  %v1512_v23 = vpop.f32.mrb[60].mxu1  ;;  %1735 = vmatpush3.bf16.msra.mxu1 %v1734_v9 }
 0x2f3   :  { %v1513_v24 = vpop.f32.mrb[61].mxu1 }
 0x2f4   :  { %v1514_v25 = vadd.f32 %v1513_v24, %v1512_v23  ;;  %v1515_v26 = vpop.f32.mrb[62].mxu1  ;;  %v889_v27 = vpack.c.bf16 %v872_v22, %v871_v21 }
 0x2f5   :  { %v1516_v28 = vpop.f32.mrb[63].mxu1 }
 0x2f6   :  { %v837_v29 = vadd.f32 %v1514_v25, %v2154_v49  ;;  %v1517_v30 = vadd.f32 %v1516_v28, %v1515_v26  ;;  %1673 = vmatprep.mubr.bf16.mxu0 %v889_v27 }
 0x2f8   :  { %v840_v31 = vadd.f32 %v1517_v30, %v2154_v49  ;;  %v873_v32 = vmax.f32 %v837_v29, 0.0 }
 0x2fa   :  { %v874_v33 = vmax.f32 %v840_v31, 0.0 }
 0x2fc   :  { %v890_v34 = vpack.c.bf16 %v874_v33, %v873_v32 }
 0x2fe   :  { %1674 = vmatmul.mubr.bf16.gmra.mrb[60].mxu0 %v890_v34 }
 0x2ff   :  { %1179 = vmatprep.mubr.bf16.mxu0 %v1380_v36 }
 0x361   :  { %v2192_v43 = vpop.f32.mrb[32].mxu0 }
 0x362   :  { %v2194_v49 = vpop.f32.mrb[33].mxu0 }
 0x363   :  { %v2196_v45 = vpop.f32.mrb[34].mxu0 }
 0x364   :  { %v1118_v48 = vpack.c.bf16 %v2196_v45, %v2192_v43  ;;  %v992_v50 = vpop.f32.mrb[35].mxu0 }
 0x365   :  { %v1117_v51 = vpack.c.bf16 %v992_v50, %v2194_v49  ;;  %v1378_v50 = vld [vmem:[%s2227_s6] ss:$0 sm:$0xff]  ;;  %s2013_s6 = smov [#allocation13]  }
 0x366   :  { %s1301_s23 = sshll.u32 %s2013_s6, 4  ;;  %s1302_s23 = int_to_ptr.vmem [resolvable:$true] %s1301_s23 }
 0x367   :  { %s1968_s8 = scalar_lea.vmem %s1302_s23, 128  ;;  %p1973_p7 = scmp.lt.s32.totalorder %s1302_s23, %s1302_s23 }
 0x368   :  { %p1969_p6 = scmp.ne.s32.totalorder %s1302_s23, %s1968_s8  ;;  %p1974_p8 = scmp.lt.s32.totalorder %s1968_s8, %s1968_s8 }
 0x36a   :  { %p1975_p9 = por %p1974_p8, %p1973_p7 }
 0x36c   :  { %p1976_p10 = pnand %p1975_p9, %p1969_p6 }
 0x371   :  { %v1651_v61 = vpop.f32.mrb[36].mxu0 }
 0x372   :  { %v1005_v62 = vpop.f32.mrb[37].mxu0 }
 0x373   :  { %v1652_v0 = vpop.f32.mrb[38].mxu0 }
 0x374   :  { %v1120_v3 = vpack.c.bf16 %v1652_v0, %v1651_v61  ;;  %v1008_v4 = vpop.f32.mrb[39].mxu0 }
 0x375   :  { %v1119_v5 = vpack.c.bf16 %v1008_v4, %v1005_v62 }
 0x381   :  { %v1655_v10 = vpop.f32.mrb[40].mxu0 }
 0x382   :  { %v1021_v11 = vpop.f32.mrb[41].mxu0 }
 0x383   :  { %v1656_v12 = vpop.f32.mrb[42].mxu0 }
 0x384   :  { %v1122_v13 = vpack.c.bf16 %v1656_v12, %v1655_v10  ;;  %v1024_v14 = vpop.f32.mrb[43].mxu0 }
 0x385   :  { %v1121_v15 = vpack.c.bf16 %v1024_v14, %v1021_v11 }
 0x391   :  { %v1659_v16 = vpop.f32.mrb[44].mxu0 }
 0x392   :  { %v1037_v17 = vpop.f32.mrb[45].mxu0 }
 0x393   :  { %v1660_v18 = vpop.f32.mrb[46].mxu0 }
 0x394   :  { %v1124_v19 = vpack.c.bf16 %v1660_v18, %v1659_v16  ;;  %v1040_v20 = vpop.f32.mrb[47].mxu0 }
 0x395   :  { %v1123_v21 = vpack.c.bf16 %v1040_v20, %v1037_v17 }
 0x3a1   :  { %v1663_v22 = vpop.f32.mrb[48].mxu0 }
 0x3a2   :  { %v1053_v23 = vpop.f32.mrb[49].mxu0 }
 0x3a3   :  { %v1664_v24 = vpop.f32.mrb[50].mxu0 }
 0x3a4   :  { %v1126_v25 = vpack.c.bf16 %v1664_v24, %v1663_v22  ;;  %v1056_v26 = vpop.f32.mrb[51].mxu0 }
 0x3a5   :  { %v1125_v27 = vpack.c.bf16 %v1056_v26, %v1053_v23 }
 0x3a7   :  { %1542 = vmatprep.subr.bf16.mxu0 %v1125_v27 }
 0x3a8   :  { %1543 = vmatpush3.bf16.msra.mxu0 %v1117_v51 }
 0x3a9   :  { %1544 = vmatprep.subr.bf16.mxu0 %v1126_v25 }
 0x3ac   :  { %1545 = vmatpush3.bf16.msra.mxu0 %v1118_v48 }
 0x3b1   :  { %v1667_v28 = vpop.f32.mrb[52].mxu0 }
 0x3b2   :  { %v1069_v29 = vpop.f32.mrb[53].mxu0 }
 0x3b3   :  { %v1668_v30 = vpop.f32.mrb[54].mxu0 }
 0x3b4   :  { %v1128_v31 = vpack.c.bf16 %v1668_v30, %v1667_v28  ;;  %v1072_v32 = vpop.f32.mrb[55].mxu0 }
 0x3b5   :  { %v1127_v33 = vpack.c.bf16 %v1072_v32, %v1069_v29 }
 0x3b7   :  { %1546 = vmatprep.subr.bf16.mxu0 %v1127_v33 }
 0x3b8   :  { %1547 = vmatpush3.bf16.msra.mxu0 %v1119_v5 }
 0x3b9   :  { %1548 = vmatprep.subr.bf16.mxu0 %v1128_v31 }
 0x3bc   :  { %1549 = vmatpush3.bf16.msra.mxu0 %v1120_v3 }
 0x3c1   :  { %v1671_v34 = vpop.f32.mrb[56].mxu0 }
 0x3c2   :  { %v1085_v36 = vpop.f32.mrb[57].mxu0 }
 0x3c3   :  { %v1672_v37 = vpop.f32.mrb[58].mxu0 }
 0x3c4   :  { %v1130_v38 = vpack.c.bf16 %v1672_v37, %v1671_v34  ;;  %v1088_v39 = vpop.f32.mrb[59].mxu0 }
 0x3c5   :  { %v1129_v40 = vpack.c.bf16 %v1088_v39, %v1085_v36 }
 0x3c7   :  { %1550 = vmatprep.subr.bf16.mxu0 %v1129_v40 }
 0x3c8   :  { %1551 = vmatpush3.bf16.msra.mxu0 %v1121_v15 }
 0x3c9   :  { %1552 = vmatprep.subr.bf16.mxu0 %v1130_v38 }
 0x3cc   :  { %1553 = vmatpush3.bf16.msra.mxu0 %v1122_v13 }
 0x3d1   :  { %v1675_v41 = vpop.f32.mrb[60].mxu0 }
 0x3d2   :  { %v1101_v42 = vpop.f32.mrb[61].mxu0 }
 0x3d3   :  { %v1676_v43 = vpop.f32.mrb[62].mxu0 }
 0x3d4   :  { %v1132_v49 = vpack.c.bf16 %v1676_v43, %v1675_v41  ;;  %v1104_v44 = vpop.f32.mrb[63].mxu0 }
 0x3d5   :  { %v1131_v45 = vpack.c.bf16 %v1104_v44, %v1101_v42 }
 0x3d7   :  { %1554 = vmatprep.subr.bf16.mxu0 %v1131_v45 }
 0x3d8   :  { %1555 = vmatpush3.bf16.msra.mxu0 %v1123_v21 }
 0x3d9   :  { %1556 = vmatprep.subr.bf16.mxu0 %v1132_v49 }
 0x3dc   :  { %1557 = vmatpush3.bf16.msra.mxu0 %v1124_v19 }
 0x3df   :  { %1180 = vmatmul.mubr.bf16.vlgmr.msra.gmra.mrb[64].mxu0 %v1379_v46 }
 0x4b2   :  { %v1558_v48 = vpop.f32.mrb[64].mxu0 }
 0x4b3   :  { %v1559_v51 = vpop.f32.mrb[65].mxu0 }
 0x4b4   :  { %v1560_v52 = vadd.f32 %v1559_v51, %v1558_v48  ;;  %v1561_v53 = vpop.f32.mrb[66].mxu0 }
 0x4b5   :  { %v1562_v54 = vpop.f32.mrb[67].mxu0 }
 0x4b6   :  { %v1182_v55 = vadd.f32 %v1560_v52, %v1378_v50 }
 0x4b8   :  { %1710 = vmatmul.mubr.f32.vlgmr.msra.gmra.mrb[64].mxu1 %v1182_v55 }
 0x58b   :  { %v1276_v58 = vpop.f32.mrb[64].mxu1 }
 0x58c   :  { %v1277_v59 = vadd.f32 %v1381_v35, %v1276_v58  ;;  %v1711_v60 = vpop.f32.mrb[65].mxu1 }
 0x58e   :  { %v1283_v61 = vsel %vm1282_vm1, %v1277_v59, -inf }
 0x58f   :  { %1284 = vmax.xlane.f32.xlu0 %v1283_v61 }
 0x61c   :  { %v1285_v62 = vpop.xlane.xlu0 %1284 }
 0x61d   :  { %v1286_v63 = vsub.f32 %v1283_v61, %v1285_v62 }
 0x61f   :  { %v1287_v0 = vmul.f32 1.442695, %v1286_v63 }
 0x621   :  { %1832 = vpow2.f32 %v1287_v0 }
 0x62b   :  { %v1833_v1 = vpop.eup %1832 }
 0x62c   :  { %1289 = vadd.xlane.f32.xlu0 %v1833_v1 }
 0x6b9   :  { %v1290_v2 = vpop.xlane.xlu0 %1289 }
 0x6ba   :  { %1834 = vlog2.f32 %v1290_v2 }
 0x6c4   :  { %v1835_v3 = vpop.eup %1834 }
 0x6c5   :  { %v1292_v4 = vmul.f32 0.6931472, %v1835_v3 }
 0x6c7   :  { %v1293_v5 = vsub.f32 %v1286_v63, %v1292_v4 }
 0x6c9   :  { %1294 = vst [vmem:[#allocation13] sm:$0xff] %v1293_v5 }
 0x6ca   :  { %1979 = shalt.err (!%p1976_p10)
}
 0x6cb   :  { %s1980_s28 = scalar_lea.hbm %s2230_s9, 128 }
 0x6cc   :  { %p1981_p11 = scmp.ne.s32.totalorder %s2230_s9, %s1980_s28  ;;  %p1984_p12 = scmp.lt.u32.totalorder %s1980_s28, %s2230_s9 }
 0x6ce   :  { %p1986_p13 = pnand %p1984_p12, %p1981_p11 }
 0x6d0   :  { %1989 = shalt.err (!%p1986_p13)
}
 0x6d1   :  { %1304 = dma.vmem_to_hbm [thread:$0]  %s1302_s23, 128, %s2230_s9, [#allocation4]  }
 0x6d2   :  { %1998 = dma.done.wait [#allocation4], 128  }
 0x6d3   :  { %1999 = vsyncadd [#allocation4], 4294967168 }
 0x6d4   :  { %1308 = vsyncpa [#allocation3], 1 }
 0x6d5   :  { %1309 = vsyncpa [#allocation6], 1 }
 0x6d6   :  { %1310 = vsyncpa [#allocation9], 1 }
 0x6d7   :  { %1311 = vsyncpa [#allocation12], 1 }
 0x6d8   :  { %1312 = vsyncpa [#allocation4], 1 }

</bundles_post_ra>
